<compile_context>
chip_gen: v7x
topology: tpu7x:2x2x1
jax: 0.10.0
libtpu: 0.0.40
codegen_flags: <defaults>
</compile_context>

<pallas_src>
import jax
import jax.numpy as jnp
from jax.experimental import pallas as pl
from jax.experimental.pallas import tpu as pltpu


# ---------------------------------------------------------------------------
# shared layernorm helper (pure jnp -> usable inside kernels and in the ref)
# ---------------------------------------------------------------------------
def _layernorm(x, g, b, eps=1e-5):
    mu = jnp.mean(x, axis=-1, keepdims=True)
    var = jnp.mean((x - mu) ** 2, axis=-1, keepdims=True)
    return (x - mu) * jax.lax.rsqrt(var + eps) * g + b


# ---------------------------------------------------------------------------
# Kernel 1: coalesced token-embedding gather.
# Token table stays in HBM; R rows per grid step via manual in-flight DMAs.
# ---------------------------------------------------------------------------
def embed_gather(tokens, tok_table, rows_per_step=8):
    """tokens (B,S) int -> (B*S, D) f32 gathered token embeddings."""
    B, S = tokens.shape
    V, D = tok_table.shape
    R = rows_per_step
    N = B * S
    # Clamp: TPU row DMAs are not bounds-checked; OOB ids would read garbage.
    ids = jnp.clip(tokens.reshape(-1).astype(jnp.int32), 0, V - 1)
    N_pad = ((N + R - 1) // R) * R
    if N_pad != N:
        ids = jnp.concatenate([ids, jnp.zeros((N_pad - N,), jnp.int32)])

    def gather_kernel(ids_ref, tok_hbm, out_ref, row_buf, sems):
        i = pl.program_id(0)
        copies = []
        for r in range(R):                                  # static unroll: R DMAs in flight
            row = ids_ref[i * R + r]
            cp = pltpu.make_async_copy(tok_hbm.at[pl.ds(row, 1)],
                                       row_buf.at[pl.ds(r, 1)],
                                       sems.at[r])
            cp.start()
            copies.append(cp)
        for cp in copies:
            cp.wait()
        out_ref[...] = row_buf[...]                         # dense (R, D) store

    out = pl.pallas_call(
        gather_kernel,
        out_shape=jax.ShapeDtypeStruct((N_pad, D), tok_table.dtype),
        grid_spec=pltpu.PrefetchScalarGridSpec(
            num_scalar_prefetch=1,                          # ids -> SMEM
            grid=(N_pad // R,),
            in_specs=[pl.BlockSpec(memory_space=pl.ANY)],   # table stays in HBM
            out_specs=pl.BlockSpec((R, D), lambda i, ids: (i, 0)),
            scratch_shapes=[pltpu.VMEM((R, D), tok_table.dtype),
                            pltpu.SemaphoreType.DMA((R,))],
        ),
        compiler_params=pltpu.CompilerParams(dimension_semantics=("arbitrary",)),
    )(ids, tok_table)
    return out[:N]


# ---------------------------------------------------------------------------
# Kernel 2: fully fused transformer (pos add + all layers + final LayerNorm).
# Grid = (n_layer,); residual stream (B*S, D) kept resident in VMEM scratch.
# ---------------------------------------------------------------------------
def make_encoder_kernel(B, S, heads, dim_head):
    scale = dim_head ** -0.5
    HD = heads * dim_head
    N = B * S

    def encoder_kernel(x0_ref, pos_ref,
                       ln1_g_ref, ln1_b_ref,
                       wq_ref, wk_ref, wv_ref, wo_ref, bo_ref,
                       ln2_g_ref, ln2_b_ref,
                       w1_ref, b1_ref, w2_ref, b2_ref,
                       fin_g_ref, fin_b_ref,
                       o_ref, x_scr):
        l = pl.program_id(0)

        # ----- first layer: token emb + positional emb (broadcast over batch)
        @pl.when(l == 0)
        def _():
            x0 = x0_ref[...].reshape(B, S, -1)
            x_scr[...] = (x0 + pos_ref[...][None]).reshape(N, -1)

        x = x_scr[...]                                      # (N, D), N = B*S

        # ----- pre-norm multi-head self-attention + residual ----------------
        h = _layernorm(x, ln1_g_ref[...], ln1_b_ref[...])
        q = jnp.dot(h, wq_ref[...], preferred_element_type=jnp.float32)   # (N, HD)
        k = jnp.dot(h, wk_ref[...], preferred_element_type=jnp.float32)
        v = jnp.dot(h, wv_ref[...], preferred_element_type=jnp.float32)
        q3 = q.reshape(B, S, HD)
        k3 = k.reshape(B, S, HD)
        v3 = v.reshape(B, S, HD)

        head_outs = []
        for hd in range(heads):                             # static unroll; B-batched dots
            sl = slice(hd * dim_head, (hd + 1) * dim_head)
            s = jnp.einsum("bqd,bkd->bqk", q3[..., sl], k3[..., sl],
                           preferred_element_type=jnp.float32) * scale    # (B, S, S)
            s = s - jnp.max(s, axis=-1, keepdims=True)
            p = jnp.exp(s)
            p = p * pl.reciprocal(jnp.sum(p, axis=-1, keepdims=True), approx=True)
            head_outs.append(
                jnp.einsum("bqk,bkd->bqd", p, v3[..., sl],
                           preferred_element_type=jnp.float32))           # (B, S, Dh)
        attn = jnp.concatenate(head_outs, axis=-1).reshape(N, HD)
        attn = jnp.dot(attn, wo_ref[...],
                       preferred_element_type=jnp.float32) + bo_ref[...]
        x = x + attn

        # ----- pre-norm feed-forward (GELU) + residual -----------------------
        h2 = _layernorm(x, ln2_g_ref[...], ln2_b_ref[...])
        ff = jnp.dot(h2, w1_ref[...], preferred_element_type=jnp.float32) + b1_ref[...]
        ff = jax.nn.gelu(ff, approximate=True)   # TODO(synk): torch uses exact erf GELU
        ff = jnp.dot(ff, w2_ref[...], preferred_element_type=jnp.float32) + b2_ref[...]
        x = x + ff

        x_scr[...] = x                                      # residual stays in VMEM

        # ----- final LayerNorm + single HBM writeback on the last layer -----
        @pl.when(l == pl.num_programs(0) - 1)
        def _():
            o_ref[...] = _layernorm(x, fin_g_ref[...], fin_b_ref[...]).astype(o_ref.dtype)

    return encoder_kernel


def encoder_forward(x0, pos, p, fin_g, fin_b, *, B, S, heads, dim_head):
    N, D = x0.shape
    L = p["wq"].shape[0]
    HD = heads * dim_head
    Dff = p["w1"].shape[-1]

    def stacked(a, b):          # per-layer weight, selected by the layer grid axis
        return pl.BlockSpec((None, a, b), lambda l: (l, 0, 0))

    def resident(shape):        # same block every step -> fetched once, stays in VMEM
        return pl.BlockSpec(shape, lambda l: tuple(0 for _ in shape))

    in_specs = [
        resident((N, D)),                                   # gathered token embeddings
        resident((S, D)),                                   # pos_emb[:S]
        stacked(1, D), stacked(1, D),                       # ln1 gamma, beta
        stacked(D, HD), stacked(D, HD), stacked(D, HD),     # wq, wk, wv
        stacked(HD, D), stacked(1, D),                      # wo, bo
        stacked(1, D), stacked(1, D),                       # ln2 gamma, beta
        stacked(D, Dff), stacked(1, Dff),                   # w1, b1
        stacked(Dff, D), stacked(1, D),                     # w2, b2
        resident((1, D)), resident((1, D)),                 # final norm gamma, beta
    ]
    # NOTE(v7x): grid=(L,) is serial by design (layer l+1 depends on l); for
    # larger batches add a leading "parallel" batch-block axis so both TCs work.
    return pl.pallas_call(
        make_encoder_kernel(B, S, heads, dim_head),
        out_shape=jax.ShapeDtypeStruct((N, D), jnp.float32),
        grid_spec=pltpu.PrefetchScalarGridSpec(
            num_scalar_prefetch=0,
            grid=(L,),
            in_specs=in_specs,
            out_specs=resident((N, D)),
            scratch_shapes=[pltpu.VMEM((N, D), jnp.float32)],   # residual stream
        ),
        compiler_params=pltpu.CompilerParams(dimension_semantics=("arbitrary",)),
    )(x0, pos,
      p["ln1_g"], p["ln1_b"], p["wq"], p["wk"], p["wv"], p["wo"], p["bo"],
      p["ln2_g"], p["ln2_b"], p["w1"], p["b1"], p["w2"], p["b2"],
      fin_g, fin_b)


# ---------------------------------------------------------------------------
# Module wrapper (deterministic synthetic init, mirrors TransformerWrapper+Encoder)
# ---------------------------------------------------------------------------
class BERTEmbedderPallas:
    """Pallas port of BERTEmbedder.forward (use_tokenizer=False path)."""

    def __init__(self, n_embed, n_layer, vocab_size=30522, max_seq_len=77,
                 heads=4, dim_head=32, ff_mult=4, seed=0):
        self.heads = heads
        self.dim_head = dim_head
        D, HD, Dff, L = n_embed, heads * dim_head, ff_mult * n_embed, n_layer

        def nrm(k, shape, std=0.02):
            return std * jax.random.normal(k, shape, dtype=jnp.float32)

        keys = jax.random.split(jax.random.PRNGKey(seed), 11)
        # Token table stays in HBM (row-gather kernel); kept f32 here for exact
        # reference comparison (bf16 halves per-row DMA traffic on real configs).
        self.tok_emb = nrm(keys[0], (vocab_size, D))
        self.pos_emb = nrm(keys[1], (max_seq_len, D))

        self.params = dict(
            ln1_g=jnp.ones((L, 1, D), jnp.float32),
            ln1_b=jnp.zeros((L, 1, D), jnp.float32),
            wq=nrm(keys[2], (L, D, HD)), wk=nrm(keys[3], (L, D, HD)),
            wv=nrm(keys[4], (L, D, HD)),
            wo=nrm(keys[5], (L, HD, D)), bo=nrm(keys[6], (L, 1, D)),
            ln2_g=jnp.ones((L, 1, D), jnp.float32),
            ln2_b=jnp.zeros((L, 1, D), jnp.float32),
            w1=nrm(keys[7], (L, D, Dff)), b1=nrm(keys[8], (L, 1, Dff)),
            w2=nrm(keys[9], (L, Dff, D)), b2=nrm(keys[10], (L, 1, D)),
        )
        self.final_g = jnp.ones((1, D), jnp.float32)
        self.final_b = jnp.zeros((1, D), jnp.float32)

    def __call__(self, tokens):
        B, S = tokens.shape
        emb = embed_gather(tokens, self.tok_emb)                      # (B*S, D)
        out = encoder_forward(emb, self.pos_emb[:S], self.params,
                              self.final_g, self.final_b,
                              B=B, S=S, heads=self.heads, dim_head=self.dim_head)
        return out.reshape(B, S, -1)


# ---------------------------------------------------------------------------
# Pure-JAX reference (same math, no Pallas)
# ---------------------------------------------------------------------------
def reference_forward(m, tokens):
    B, S = tokens.shape
    H, Dh = m.heads, m.dim_head
    p = m.params
    L = p["wq"].shape[0]
    x = m.tok_emb[tokens] + m.pos_emb[:S][None]
    for l in range(L):
        h = _layernorm(x, p["ln1_g"][l], p["ln1_b"][l])
        q = (h @ p["wq"][l]).reshape(B, S, H, Dh)
        k = (h @ p["wk"][l]).reshape(B, S, H, Dh)
        v = (h @ p["wv"][l]).reshape(B, S, H, Dh)
        s = jnp.einsum("bqhd,bkhd->bhqk", q, k) * (Dh ** -0.5)
        a = jax.nn.softmax(s, axis=-1)
        o = jnp.einsum("bhqk,bkhd->bqhd", a, v).reshape(B, S, H * Dh)
        x = x + o @ p["wo"][l] + p["bo"][l]
        h2 = _layernorm(x, p["ln2_g"][l], p["ln2_b"][l])
        ff = jax.nn.gelu(h2 @ p["w1"][l] + p["b1"][l], approximate=True)
        x = x + ff @ p["w2"][l] + p["b2"][l]
    return _layernorm(x, m.final_g, m.final_b)


if __name__ == "__main__":
    n_embed, n_layer = 128, 2
    vocab_size, max_seq_len = 30522, 77
    B, S = 2, 16

    module = BERTEmbedderPallas(n_embed=n_embed, n_layer=n_layer,
                                vocab_size=vocab_size, max_seq_len=max_seq_len,
                                heads=4, dim_head=32, seed=0)

    tokens = jax.random.randint(jax.random.PRNGKey(0), (B, S), 0, vocab_size,
                                dtype=jnp.int32)

    out = module(tokens)
    out = jax.block_until_ready(out)

    ref = reference_forward(module, tokens)
    assert out.shape == (B, S, n_embed), out.shape
    assert bool(jnp.allclose(out, ref, atol=2e-2, rtol=2e-2)), (
        "max abs err = %g" % float(jnp.max(jnp.abs(out - ref))))

    print("KERNEL_OK")
</pallas_src>

<mosaic_0001>
module attributes {stable_mosaic.version = 11 : i64} {
  func.func @gather_kernel(%arg0: i32, %arg1: memref<32xi32, #tpu.memory_space<smem>>, %arg2: memref<30522x128xf32, #tpu.memory_space<any>>, %arg3: memref<8x128xf32, #tpu.memory_space<vmem>>, %arg4: memref<8x128xf32, #tpu.memory_space<vmem>>, %arg5: memref<8x!tpu.dma_semaphore, #tpu.memory_space<semaphore_mem>>) attributes {dimension_semantics = [#tpu.dimension_semantics<arbitrary>], iteration_bounds = array<i64: 4>, scalar_prefetch = 1 : i64, scratch_operands = 2 : i64, tpu.core_type = #tpu.core_type<tc>, window_params = [{}, {transform_indices = @transform_1, window_bounds = array<i64: 8, 128>}]} {
    %c8_i32 = arith.constant 8 : i32
    %0 = arith.muli %arg0, %c8_i32 : i32
    %c0_i32 = arith.constant 0 : i32
    %1 = arith.addi %0, %c0_i32 : i32
    %2 = arith.index_cast %1 : i32 to index
    %3 = memref.load %arg1[%2] : memref<32xi32, #tpu.memory_space<smem>>
    %c0_i32_0 = arith.constant 0 : i32
    %c0_i32_1 = arith.constant 0 : i32
    %4 = tpu.memref_slice %arg2[%3, %c0_i32_1] : memref<30522x128xf32, #tpu.memory_space<any>> -> memref<1x128xf32, #tpu.memory_space<any>>
    %c0_i32_2 = arith.constant 0 : i32
    %c0_i32_3 = arith.constant 0 : i32
    %5 = tpu.memref_slice %arg4[%c0_i32_2, %c0_i32_3] : memref<8x128xf32, #tpu.memory_space<vmem>> -> memref<1x128xf32, #tpu.memory_space<vmem>>
    %6 = tpu.memref_slice %arg5[%c0_i32_0] : memref<8x!tpu.dma_semaphore, #tpu.memory_space<semaphore_mem>> -> memref<1x!tpu.dma_semaphore, #tpu.memory_space<semaphore_mem>>
    %7 = tpu.memref_squeeze %6 : memref<1x!tpu.dma_semaphore, #tpu.memory_space<semaphore_mem>> -> memref<!tpu.dma_semaphore, #tpu.memory_space<semaphore_mem>>
    tpu.enqueue_dma source(%4 : memref<1x128xf32, #tpu.memory_space<any>>) target(%5 : memref<1x128xf32, #tpu.memory_space<vmem>>) target_semaphore(%7 : memref<!tpu.dma_semaphore, #tpu.memory_space<semaphore_mem>>)
    %c8_i32_4 = arith.constant 8 : i32
    %8 = arith.muli %arg0, %c8_i32_4 : i32
    %c1_i32 = arith.constant 1 : i32
    %9 = arith.addi %8, %c1_i32 : i32
    %10 = arith.index_cast %9 : i32 to index
    %11 = memref.load %arg1[%10] : memref<32xi32, #tpu.memory_space<smem>>
    %c1_i32_5 = arith.constant 1 : i32
    %c0_i32_6 = arith.constant 0 : i32
    %12 = tpu.memref_slice %arg2[%11, %c0_i32_6] : memref<30522x128xf32, #tpu.memory_space<any>> -> memref<1x128xf32, #tpu.memory_space<any>>
    %c1_i32_7 = arith.constant 1 : i32
    %c0_i32_8 = arith.constant 0 : i32
    %13 = tpu.memref_slice %arg4[%c1_i32_7, %c0_i32_8] : memref<8x128xf32, #tpu.memory_space<vmem>> -> memref<1x128xf32, #tpu.memory_space<vmem>>
    %14 = tpu.memref_slice %arg5[%c1_i32_5] : memref<8x!tpu.dma_semaphore, #tpu.memory_space<semaphore_mem>> -> memref<1x!tpu.dma_semaphore, #tpu.memory_space<semaphore_mem>>
    %15 = tpu.memref_squeeze %14 : memref<1x!tpu.dma_semaphore, #tpu.memory_space<semaphore_mem>> -> memref<!tpu.dma_semaphore, #tpu.memory_space<semaphore_mem>>
    tpu.enqueue_dma source(%12 : memref<1x128xf32, #tpu.memory_space<any>>) target(%13 : memref<1x128xf32, #tpu.memory_space<vmem>>) target_semaphore(%15 : memref<!tpu.dma_semaphore, #tpu.memory_space<semaphore_mem>>)
    %c8_i32_9 = arith.constant 8 : i32
    %16 = arith.muli %arg0, %c8_i32_9 : i32
    %c2_i32 = arith.constant 2 : i32
    %17 = arith.addi %16, %c2_i32 : i32
    %18 = arith.index_cast %17 : i32 to index
    %19 = memref.load %arg1[%18] : memref<32xi32, #tpu.memory_space<smem>>
    %c2_i32_10 = arith.constant 2 : i32
    %c0_i32_11 = arith.constant 0 : i32
    %20 = tpu.memref_slice %arg2[%19, %c0_i32_11] : memref<30522x128xf32, #tpu.memory_space<any>> -> memref<1x128xf32, #tpu.memory_space<any>>
    %c2_i32_12 = arith.constant 2 : i32
    %c0_i32_13 = arith.constant 0 : i32
    %21 = tpu.memref_slice %arg4[%c2_i32_12, %c0_i32_13] : memref<8x128xf32, #tpu.memory_space<vmem>> -> memref<1x128xf32, #tpu.memory_space<vmem>>
    %22 = tpu.memref_slice %arg5[%c2_i32_10] : memref<8x!tpu.dma_semaphore, #tpu.memory_space<semaphore_mem>> -> memref<1x!tpu.dma_semaphore, #tpu.memory_space<semaphore_mem>>
    %23 = tpu.memref_squeeze %22 : memref<1x!tpu.dma_semaphore, #tpu.memory_space<semaphore_mem>> -> memref<!tpu.dma_semaphore, #tpu.memory_space<semaphore_mem>>
    tpu.enqueue_dma source(%20 : memref<1x128xf32, #tpu.memory_space<any>>) target(%21 : memref<1x128xf32, #tpu.memory_space<vmem>>) target_semaphore(%23 : memref<!tpu.dma_semaphore, #tpu.memory_space<semaphore_mem>>)
    %c8_i32_14 = arith.constant 8 : i32
    %24 = arith.muli %arg0, %c8_i32_14 : i32
    %c3_i32 = arith.constant 3 : i32
    %25 = arith.addi %24, %c3_i32 : i32
    %26 = arith.index_cast %25 : i32 to index
    %27 = memref.load %arg1[%26] : memref<32xi32, #tpu.memory_space<smem>>
    %c3_i32_15 = arith.constant 3 : i32
    %c0_i32_16 = arith.constant 0 : i32
    %28 = tpu.memref_slice %arg2[%27, %c0_i32_16] : memref<30522x128xf32, #tpu.memory_space<any>> -> memref<1x128xf32, #tpu.memory_space<any>>
    %c3_i32_17 = arith.constant 3 : i32
    %c0_i32_18 = arith.constant 0 : i32
    %29 = tpu.memref_slice %arg4[%c3_i32_17, %c0_i32_18] : memref<8x128xf32, #tpu.memory_space<vmem>> -> memref<1x128xf32, #tpu.memory_space<vmem>>
    %30 = tpu.memref_slice %arg5[%c3_i32_15] : memref<8x!tpu.dma_semaphore, #tpu.memory_space<semaphore_mem>> -> memref<1x!tpu.dma_semaphore, #tpu.memory_space<semaphore_mem>>
    %31 = tpu.memref_squeeze %30 : memref<1x!tpu.dma_semaphore, #tpu.memory_space<semaphore_mem>> -> memref<!tpu.dma_semaphore, #tpu.memory_space<semaphore_mem>>
    tpu.enqueue_dma source(%28 : memref<1x128xf32, #tpu.memory_space<any>>) target(%29 : memref<1x128xf32, #tpu.memory_space<vmem>>) target_semaphore(%31 : memref<!tpu.dma_semaphore, #tpu.memory_space<semaphore_mem>>)
    %c8_i32_19 = arith.constant 8 : i32
    %32 = arith.muli %arg0, %c8_i32_19 : i32
    %c4_i32 = arith.constant 4 : i32
    %33 = arith.addi %32, %c4_i32 : i32
    %34 = arith.index_cast %33 : i32 to index
    %35 = memref.load %arg1[%34] : memref<32xi32, #tpu.memory_space<smem>>
    %c4_i32_20 = arith.constant 4 : i32
    %c0_i32_21 = arith.constant 0 : i32
    %36 = tpu.memref_slice %arg2[%35, %c0_i32_21] : memref<30522x128xf32, #tpu.memory_space<any>> -> memref<1x128xf32, #tpu.memory_space<any>>
    %c4_i32_22 = arith.constant 4 : i32
    %c0_i32_23 = arith.constant 0 : i32
    %37 = tpu.memref_slice %arg4[%c4_i32_22, %c0_i32_23] : memref<8x128xf32, #tpu.memory_space<vmem>> -> memref<1x128xf32, #tpu.memory_space<vmem>>
    %38 = tpu.memref_slice %arg5[%c4_i32_20] : memref<8x!tpu.dma_semaphore, #tpu.memory_space<semaphore_mem>> -> memref<1x!tpu.dma_semaphore, #tpu.memory_space<semaphore_mem>>
    %39 = tpu.memref_squeeze %38 : memref<1x!tpu.dma_semaphore, #tpu.memory_space<semaphore_mem>> -> memref<!tpu.dma_semaphore, #tpu.memory_space<semaphore_mem>>
    tpu.enqueue_dma source(%36 : memref<1x128xf32, #tpu.memory_space<any>>) target(%37 : memref<1x128xf32, #tpu.memory_space<vmem>>) target_semaphore(%39 : memref<!tpu.dma_semaphore, #tpu.memory_space<semaphore_mem>>)
    %c8_i32_24 = arith.constant 8 : i32
    %40 = arith.muli %arg0, %c8_i32_24 : i32
    %c5_i32 = arith.constant 5 : i32
    %41 = arith.addi %40, %c5_i32 : i32
    %42 = arith.index_cast %41 : i32 to index
    %43 = memref.load %arg1[%42] : memref<32xi32, #tpu.memory_space<smem>>
    %c5_i32_25 = arith.constant 5 : i32
    %c0_i32_26 = arith.constant 0 : i32
    %44 = tpu.memref_slice %arg2[%43, %c0_i32_26] : memref<30522x128xf32, #tpu.memory_space<any>> -> memref<1x128xf32, #tpu.memory_space<any>>
    %c5_i32_27 = arith.constant 5 : i32
    %c0_i32_28 = arith.constant 0 : i32
    %45 = tpu.memref_slice %arg4[%c5_i32_27, %c0_i32_28] : memref<8x128xf32, #tpu.memory_space<vmem>> -> memref<1x128xf32, #tpu.memory_space<vmem>>
    %46 = tpu.memref_slice %arg5[%c5_i32_25] : memref<8x!tpu.dma_semaphore, #tpu.memory_space<semaphore_mem>> -> memref<1x!tpu.dma_semaphore, #tpu.memory_space<semaphore_mem>>
    %47 = tpu.memref_squeeze %46 : memref<1x!tpu.dma_semaphore, #tpu.memory_space<semaphore_mem>> -> memref<!tpu.dma_semaphore, #tpu.memory_space<semaphore_mem>>
    tpu.enqueue_dma source(%44 : memref<1x128xf32, #tpu.memory_space<any>>) target(%45 : memref<1x128xf32, #tpu.memory_space<vmem>>) target_semaphore(%47 : memref<!tpu.dma_semaphore, #tpu.memory_space<semaphore_mem>>)
    %c8_i32_29 = arith.constant 8 : i32
    %48 = arith.muli %arg0, %c8_i32_29 : i32
    %c6_i32 = arith.constant 6 : i32
    %49 = arith.addi %48, %c6_i32 : i32
    %50 = arith.index_cast %49 : i32 to index
    %51 = memref.load %arg1[%50] : memref<32xi32, #tpu.memory_space<smem>>
    %c6_i32_30 = arith.constant 6 : i32
    %c0_i32_31 = arith.constant 0 : i32
    %52 = tpu.memref_slice %arg2[%51, %c0_i32_31] : memref<30522x128xf32, #tpu.memory_space<any>> -> memref<1x128xf32, #tpu.memory_space<any>>
    %c6_i32_32 = arith.constant 6 : i32
    %c0_i32_33 = arith.constant 0 : i32
    %53 = tpu.memref_slice %arg4[%c6_i32_32, %c0_i32_33] : memref<8x128xf32, #tpu.memory_space<vmem>> -> memref<1x128xf32, #tpu.memory_space<vmem>>
    %54 = tpu.memref_slice %arg5[%c6_i32_30] : memref<8x!tpu.dma_semaphore, #tpu.memory_space<semaphore_mem>> -> memref<1x!tpu.dma_semaphore, #tpu.memory_space<semaphore_mem>>
    %55 = tpu.memref_squeeze %54 : memref<1x!tpu.dma_semaphore, #tpu.memory_space<semaphore_mem>> -> memref<!tpu.dma_semaphore, #tpu.memory_space<semaphore_mem>>
    tpu.enqueue_dma source(%52 : memref<1x128xf32, #tpu.memory_space<any>>) target(%53 : memref<1x128xf32, #tpu.memory_space<vmem>>) target_semaphore(%55 : memref<!tpu.dma_semaphore, #tpu.memory_space<semaphore_mem>>)
    %c8_i32_34 = arith.constant 8 : i32
    %56 = arith.muli %arg0, %c8_i32_34 : i32
    %c7_i32 = arith.constant 7 : i32
    %57 = arith.addi %56, %c7_i32 : i32
    %58 = arith.index_cast %57 : i32 to index
    %59 = memref.load %arg1[%58] : memref<32xi32, #tpu.memory_space<smem>>
    %c7_i32_35 = arith.constant 7 : i32
    %c0_i32_36 = arith.constant 0 : i32
    %60 = tpu.memref_slice %arg2[%59, %c0_i32_36] : memref<30522x128xf32, #tpu.memory_space<any>> -> memref<1x128xf32, #tpu.memory_space<any>>
    %c7_i32_37 = arith.constant 7 : i32
    %c0_i32_38 = arith.constant 0 : i32
    %61 = tpu.memref_slice %arg4[%c7_i32_37, %c0_i32_38] : memref<8x128xf32, #tpu.memory_space<vmem>> -> memref<1x128xf32, #tpu.memory_space<vmem>>
    %62 = tpu.memref_slice %arg5[%c7_i32_35] : memref<8x!tpu.dma_semaphore, #tpu.memory_space<semaphore_mem>> -> memref<1x!tpu.dma_semaphore, #tpu.memory_space<semaphore_mem>>
    %63 = tpu.memref_squeeze %62 : memref<1x!tpu.dma_semaphore, #tpu.memory_space<semaphore_mem>> -> memref<!tpu.dma_semaphore, #tpu.memory_space<semaphore_mem>>
    tpu.enqueue_dma source(%60 : memref<1x128xf32, #tpu.memory_space<any>>) target(%61 : memref<1x128xf32, #tpu.memory_space<vmem>>) target_semaphore(%63 : memref<!tpu.dma_semaphore, #tpu.memory_space<semaphore_mem>>)
    %c0_i32_39 = arith.constant 0 : i32
    %c0_i32_40 = arith.constant 0 : i32
    %64 = tpu.memref_slice %arg2[%3, %c0_i32_40] : memref<30522x128xf32, #tpu.memory_space<any>> -> memref<1x128xf32, #tpu.memory_space<any>>
    %c0_i32_41 = arith.constant 0 : i32
    %c0_i32_42 = arith.constant 0 : i32
    %65 = tpu.memref_slice %arg4[%c0_i32_41, %c0_i32_42] : memref<8x128xf32, #tpu.memory_space<vmem>> -> memref<1x128xf32, #tpu.memory_space<vmem>>
    %66 = tpu.memref_slice %arg5[%c0_i32_39] : memref<8x!tpu.dma_semaphore, #tpu.memory_space<semaphore_mem>> -> memref<1x!tpu.dma_semaphore, #tpu.memory_space<semaphore_mem>>
    %67 = tpu.memref_squeeze %66 : memref<1x!tpu.dma_semaphore, #tpu.memory_space<semaphore_mem>> -> memref<!tpu.dma_semaphore, #tpu.memory_space<semaphore_mem>>
    tpu.wait_dma2 semaphore(%67 : memref<!tpu.dma_semaphore, #tpu.memory_space<semaphore_mem>>) src(%64 : memref<1x128xf32, #tpu.memory_space<any>>) dst(%65 : memref<1x128xf32, #tpu.memory_space<vmem>>)
    %c1_i32_43 = arith.constant 1 : i32
    %c0_i32_44 = arith.constant 0 : i32
    %68 = tpu.memref_slice %arg2[%11, %c0_i32_44] : memref<30522x128xf32, #tpu.memory_space<any>> -> memref<1x128xf32, #tpu.memory_space<any>>
    %c1_i32_45 = arith.constant 1 : i32
    %c0_i32_46 = arith.constant 0 : i32
    %69 = tpu.memref_slice %arg4[%c1_i32_45, %c0_i32_46] : memref<8x128xf32, #tpu.memory_space<vmem>> -> memref<1x128xf32, #tpu.memory_space<vmem>>
    %70 = tpu.memref_slice %arg5[%c1_i32_43] : memref<8x!tpu.dma_semaphore, #tpu.memory_space<semaphore_mem>> -> memref<1x!tpu.dma_semaphore, #tpu.memory_space<semaphore_mem>>
    %71 = tpu.memref_squeeze %70 : memref<1x!tpu.dma_semaphore, #tpu.memory_space<semaphore_mem>> -> memref<!tpu.dma_semaphore, #tpu.memory_space<semaphore_mem>>
    tpu.wait_dma2 semaphore(%71 : memref<!tpu.dma_semaphore, #tpu.memory_space<semaphore_mem>>) src(%68 : memref<1x128xf32, #tpu.memory_space<any>>) dst(%69 : memref<1x128xf32, #tpu.memory_space<vmem>>)
    %c2_i32_47 = arith.constant 2 : i32
    %c0_i32_48 = arith.constant 0 : i32
    %72 = tpu.memref_slice %arg2[%19, %c0_i32_48] : memref<30522x128xf32, #tpu.memory_space<any>> -> memref<1x128xf32, #tpu.memory_space<any>>
    %c2_i32_49 = arith.constant 2 : i32
    %c0_i32_50 = arith.constant 0 : i32
    %73 = tpu.memref_slice %arg4[%c2_i32_49, %c0_i32_50] : memref<8x128xf32, #tpu.memory_space<vmem>> -> memref<1x128xf32, #tpu.memory_space<vmem>>
    %74 = tpu.memref_slice %arg5[%c2_i32_47] : memref<8x!tpu.dma_semaphore, #tpu.memory_space<semaphore_mem>> -> memref<1x!tpu.dma_semaphore, #tpu.memory_space<semaphore_mem>>
    %75 = tpu.memref_squeeze %74 : memref<1x!tpu.dma_semaphore, #tpu.memory_space<semaphore_mem>> -> memref<!tpu.dma_semaphore, #tpu.memory_space<semaphore_mem>>
    tpu.wait_dma2 semaphore(%75 : memref<!tpu.dma_semaphore, #tpu.memory_space<semaphore_mem>>) src(%72 : memref<1x128xf32, #tpu.memory_space<any>>) dst(%73 : memref<1x128xf32, #tpu.memory_space<vmem>>)
    %c3_i32_51 = arith.constant 3 : i32
    %c0_i32_52 = arith.constant 0 : i32
    %76 = tpu.memref_slice %arg2[%27, %c0_i32_52] : memref<30522x128xf32, #tpu.memory_space<any>> -> memref<1x128xf32, #tpu.memory_space<any>>
    %c3_i32_53 = arith.constant 3 : i32
    %c0_i32_54 = arith.constant 0 : i32
    %77 = tpu.memref_slice %arg4[%c3_i32_53, %c0_i32_54] : memref<8x128xf32, #tpu.memory_space<vmem>> -> memref<1x128xf32, #tpu.memory_space<vmem>>
    %78 = tpu.memref_slice %arg5[%c3_i32_51] : memref<8x!tpu.dma_semaphore, #tpu.memory_space<semaphore_mem>> -> memref<1x!tpu.dma_semaphore, #tpu.memory_space<semaphore_mem>>
    %79 = tpu.memref_squeeze %78 : memref<1x!tpu.dma_semaphore, #tpu.memory_space<semaphore_mem>> -> memref<!tpu.dma_semaphore, #tpu.memory_space<semaphore_mem>>
    tpu.wait_dma2 semaphore(%79 : memref<!tpu.dma_semaphore, #tpu.memory_space<semaphore_mem>>) src(%76 : memref<1x128xf32, #tpu.memory_space<any>>) dst(%77 : memref<1x128xf32, #tpu.memory_space<vmem>>)
    %c4_i32_55 = arith.constant 4 : i32
    %c0_i32_56 = arith.constant 0 : i32
    %80 = tpu.memref_slice %arg2[%35, %c0_i32_56] : memref<30522x128xf32, #tpu.memory_space<any>> -> memref<1x128xf32, #tpu.memory_space<any>>
    %c4_i32_57 = arith.constant 4 : i32
    %c0_i32_58 = arith.constant 0 : i32
    %81 = tpu.memref_slice %arg4[%c4_i32_57, %c0_i32_58] : memref<8x128xf32, #tpu.memory_space<vmem>> -> memref<1x128xf32, #tpu.memory_space<vmem>>
    %82 = tpu.memref_slice %arg5[%c4_i32_55] : memref<8x!tpu.dma_semaphore, #tpu.memory_space<semaphore_mem>> -> memref<1x!tpu.dma_semaphore, #tpu.memory_space<semaphore_mem>>
    %83 = tpu.memref_squeeze %82 : memref<1x!tpu.dma_semaphore, #tpu.memory_space<semaphore_mem>> -> memref<!tpu.dma_semaphore, #tpu.memory_space<semaphore_mem>>
    tpu.wait_dma2 semaphore(%83 : memref<!tpu.dma_semaphore, #tpu.memory_space<semaphore_mem>>) src(%80 : memref<1x128xf32, #tpu.memory_space<any>>) dst(%81 : memref<1x128xf32, #tpu.memory_space<vmem>>)
    %c5_i32_59 = arith.constant 5 : i32
    %c0_i32_60 = arith.constant 0 : i32
    %84 = tpu.memref_slice %arg2[%43, %c0_i32_60] : memref<30522x128xf32, #tpu.memory_space<any>> -> memref<1x128xf32, #tpu.memory_space<any>>
    %c5_i32_61 = arith.constant 5 : i32
    %c0_i32_62 = arith.constant 0 : i32
    %85 = tpu.memref_slice %arg4[%c5_i32_61, %c0_i32_62] : memref<8x128xf32, #tpu.memory_space<vmem>> -> memref<1x128xf32, #tpu.memory_space<vmem>>
    %86 = tpu.memref_slice %arg5[%c5_i32_59] : memref<8x!tpu.dma_semaphore, #tpu.memory_space<semaphore_mem>> -> memref<1x!tpu.dma_semaphore, #tpu.memory_space<semaphore_mem>>
    %87 = tpu.memref_squeeze %86 : memref<1x!tpu.dma_semaphore, #tpu.memory_space<semaphore_mem>> -> memref<!tpu.dma_semaphore, #tpu.memory_space<semaphore_mem>>
    tpu.wait_dma2 semaphore(%87 : memref<!tpu.dma_semaphore, #tpu.memory_space<semaphore_mem>>) src(%84 : memref<1x128xf32, #tpu.memory_space<any>>) dst(%85 : memref<1x128xf32, #tpu.memory_space<vmem>>)
    %c6_i32_63 = arith.constant 6 : i32
    %c0_i32_64 = arith.constant 0 : i32
    %88 = tpu.memref_slice %arg2[%51, %c0_i32_64] : memref<30522x128xf32, #tpu.memory_space<any>> -> memref<1x128xf32, #tpu.memory_space<any>>
    %c6_i32_65 = arith.constant 6 : i32
    %c0_i32_66 = arith.constant 0 : i32
    %89 = tpu.memref_slice %arg4[%c6_i32_65, %c0_i32_66] : memref<8x128xf32, #tpu.memory_space<vmem>> -> memref<1x128xf32, #tpu.memory_space<vmem>>
    %90 = tpu.memref_slice %arg5[%c6_i32_63] : memref<8x!tpu.dma_semaphore, #tpu.memory_space<semaphore_mem>> -> memref<1x!tpu.dma_semaphore, #tpu.memory_space<semaphore_mem>>
    %91 = tpu.memref_squeeze %90 : memref<1x!tpu.dma_semaphore, #tpu.memory_space<semaphore_mem>> -> memref<!tpu.dma_semaphore, #tpu.memory_space<semaphore_mem>>
    tpu.wait_dma2 semaphore(%91 : memref<!tpu.dma_semaphore, #tpu.memory_space<semaphore_mem>>) src(%88 : memref<1x128xf32, #tpu.memory_space<any>>) dst(%89 : memref<1x128xf32, #tpu.memory_space<vmem>>)
    %c7_i32_67 = arith.constant 7 : i32
    %c0_i32_68 = arith.constant 0 : i32
    %92 = tpu.memref_slice %arg2[%59, %c0_i32_68] : memref<30522x128xf32, #tpu.memory_space<any>> -> memref<1x128xf32, #tpu.memory_space<any>>
    %c7_i32_69 = arith.constant 7 : i32
    %c0_i32_70 = arith.constant 0 : i32
    %93 = tpu.memref_slice %arg4[%c7_i32_69, %c0_i32_70] : memref<8x128xf32, #tpu.memory_space<vmem>> -> memref<1x128xf32, #tpu.memory_space<vmem>>
    %94 = tpu.memref_slice %arg5[%c7_i32_67] : memref<8x!tpu.dma_semaphore, #tpu.memory_space<semaphore_mem>> -> memref<1x!tpu.dma_semaphore, #tpu.memory_space<semaphore_mem>>
    %95 = tpu.memref_squeeze %94 : memref<1x!tpu.dma_semaphore, #tpu.memory_space<semaphore_mem>> -> memref<!tpu.dma_semaphore, #tpu.memory_space<semaphore_mem>>
    tpu.wait_dma2 semaphore(%95 : memref<!tpu.dma_semaphore, #tpu.memory_space<semaphore_mem>>) src(%92 : memref<1x128xf32, #tpu.memory_space<any>>) dst(%93 : memref<1x128xf32, #tpu.memory_space<vmem>>)
    %c0 = arith.constant 0 : index
    %c0_71 = arith.constant 0 : index
    %96 = vector.load %arg4[%c0, %c0_71] : memref<8x128xf32, #tpu.memory_space<vmem>>, vector<8x128xf32>
    %c0_72 = arith.constant 0 : index
    %c0_73 = arith.constant 0 : index
    %97 = vector.load %arg3[%c0_72, %c0_73] : memref<8x128xf32, #tpu.memory_space<vmem>>, vector<8x128xf32>
    tpu.vector_store %arg3[%c0_72, %c0_73], %96 {strides = array<i32>} : memref<8x128xf32, #tpu.memory_space<vmem>>, vector<8x128xf32>,
    return
  }
  func.func @transform_1(%arg0: i32, %arg1: memref<32xi32, #tpu.memory_space<smem>>) -> (i32, i32) {
    %c0_i32 = arith.constant 0 : i32
    %c0_i32_0 = arith.constant 0 : i32
    return %arg0, %c0_i32 : i32, i32
  }
}

</mosaic_0001>

<bundles_post_ra>
// kernel: tpu_custom_call.1
= control target key start
LH: loop header
LB: loop body
LE: loop exit
PB: predicated region body
PF: predicated region fallthrough
CT: control target
= control target key end

     0   :  { %s926_s0 = inlined_call_operand.hbm [shape: s32[32], index: 0, kind: input, shape index: {}]   ;;  %s927_s1 = inlined_call_operand.hbm [shape: f32[30522,128], index: 1, kind: input, shape index: {}]   ;;  %s928_s2 = inlined_call_operand.hbm [shape: f32[32,128], index: 2, kind: output, shape index: {}]  }
   0x1   :  { %s398_s11 = scalar_lea.hbm %s926_s0, 16 }
   0x2   :  { %p399_p0 = scmp.ne.s32.totalorder %s926_s0, %s398_s11  ;;  %p402_p1 = scmp.lt.u32.totalorder %s398_s11, %s926_s0 }
   0x4   :  { %p404_p2 = pnand %p402_p1, %p399_p0 }
   0x6   :  { %407 = shalt.err (!%p404_p2)  }
   0x7   :  { %s674_s16 = smov [#allocation5]  }
   0x8   :  { %8 = dma.hbm_to_smem %s926_s0, 16, %s674_s16, [#allocation4] }
   0x9   :  { %640 = dma.done.wait [#allocation4], 16 }
   0xa   :  { %641 = vsyncadd [#allocation4], 4294967280 }
   0xb   :  { %10 = sfence }
   0xc   :  { %11 = vsyncpa [#allocation7], 0 }
   0xd   :  { %13 = vsyncpa [#allocation7 + $0x1], 0  ;;  %s711_s19 = smov 0   ;;  %s713_s20 = smov 0  }
   0xe   :  { %s715_s21 = smov 0  }
   0xf LB: > { %s333_s0 = sadd.s32 4294967295, %s672_s21   ;;  %s728_s22 = sadd.s32 1, %s672_s21   ;;  %s672_s21 = sphi %s715_s21, %s933_s21   ;;  %s668_s20 = sphi %s713_s20, %s932_s20   ;;  %s664_s19 = sphi %s711_s19, %s931_s19  }
  0x10   : > { %s22_s23 = ssub.s32 %s672_s21, %s728_s22  ;;  %s25_s24 = sadd.s32 1, %s668_s20 }
  0x11   : > { %p23_p3 = scmp.eq.s32.totalorder %s22_s23, 0  ;;  %p334_p4 = scmp.ne.s32.totalorder %s22_s23, 0 }
  0x12   : > { %p29_p5 = scmp.eq.s32.totalorder %s672_s21, 3  ;;  %p34_p6 = scmp.ne.s32.totalorder %s668_s20, %s664_s19 }
  0x13   : > { %s737_s25 = scalar_select %p23_p3, %s668_s20, %s25_s24  }
  0x14   : > { %p739_p7 = por %p334_p4, %p29_p5  ;;  %p35_p8 = scmp.eq.s32.totalorder %s333_s0, 3 }
  0x15   : > { %p335_p10 = scmp.ge.s32.totalorder %s672_s21, 4 }
  0x16   : > { %p743_p9 = por %p35_p8, %p34_p6  ;;  %s49_s28 = sand.u32 (!%p335_p10), 1, %s668_s20  }
  0x17   : > { %44 = sbr.rel (%p335_p10) target bundleno = 244 (0xf4), region = 12  ;;  %s750_s29 = sshll.u32 (!%p335_p10), %s672_s21, 3 }
  0x18   : > { %s754_s30 = sshll.u32 (!%p335_p10), %s49_s28, 3  ;;  %s53_s3 = sld [smem:[#allocation5 + %s750_s29]] (!%p335_p10) }
  0x19   : > { %s675_s4 = smov (!%p335_p10), [#allocation2]   ;;  %s67_s6 = sadd.s32 (!%p335_p10), 1, %s750_s29 }
  0x1a   : > { %s63_s5 = sshll.u32 (!%p335_p10), %s675_s4, 4  ;;  %s760_s7 = sld [smem:[#allocation5 + %s67_s6]] (!%p335_p10)  ;;  %s758_s5 = int_to_ptr.vmem [resolvable:$true] %s63_s5 }
  0x1b   : > { %s84_s8 = sadd.s32 (!%p335_p10), 2, %s750_s29  ;;  %s676_s9 = smov (!%p335_p10), [#allocation2 + $0x1]  }
  0x1c   : > { %s80_s10 = sshll.u32 (!%p335_p10), %s676_s9, 4  ;;  %s763_s11 = sld [smem:[#allocation5 + %s84_s8]] (!%p335_p10)  ;;  %s765_s10 = int_to_ptr.vmem [resolvable:$true] %s80_s10 }
  0x1d   : > { %s773_s0 = scalar_lea.hbm (!%p335_p10), %s927_s1, 488448 }
  0x1e   : > { %s338_s12 = sshll.u32 %s53_s3, 4 }
  0x1f   : > { %s55_s15 = scalar_lea.hbm %s927_s1, %s338_s12 }
  0x20   : > { %s408_s16 = scalar_lea.hbm %s55_s15, 16  ;;  %p411_p12 = scmp.lt.u32.totalorder %s55_s15, %s927_s1 }
  0x21   : > { %p409_p11 = scmp.ne.s32.totalorder %s55_s15, %s408_s16  ;;  %p412_p13 = scmp.lt.u32.totalorder %s773_s0, %s408_s16 }
  0x22   : > { %p414_p1 = scmp.lt.u32.totalorder %s408_s16, %s55_s15 }
  0x23   : > { %p413_p0 = por %p412_p13, %p411_p12 }
  0x25   : > { %p415_p2 = por %p414_p1, %p413_p0 }
  0x27   : > { %p416_p3 = pnand %p415_p2, %p409_p11 }
  0x29   : > { %419 = shalt.err (!%p416_p3)  }
  0x2a   : > { %s420_s3 = scalar_lea.vmem %s758_s5, 16  ;;  %s782_s4 = scalar_lea.vmem %s758_s5, 128 }
  0x2b   : > { %p421_p4 = scmp.ne.s32.totalorder %s758_s5, %s420_s3  ;;  %p425_p5 = scmp.lt.s32.totalorder %s758_s5, %s758_s5 }
  0x2c   : > { %p426_p6 = scmp.lt.s32.totalorder %s782_s4, %s420_s3 }
  0x2e   : > { %p427_p8 = por %p426_p6, %p425_p5 }
  0x30   : > { %p428_p10 = pnand %p427_p8, %p421_p4 }
  0x32   : > { %431 = shalt.err (!%p428_p10)  }
  0x33   : > { %66 = dma.hbm_to_vmem [thread:$0]  %s55_s15, 16, %s758_s5, [#allocation3] }
  0x34   : > { %s339_s6 = sshll.u32 %s760_s7, 4  ;;  %s677_s8 = smov [#allocation2 + $0x2]  }
  0x35   : > { %s97_s9 = sshll.u32 %s677_s8, 4  ;;  %s70_s14 = scalar_lea.hbm %s927_s1, %s339_s6  ;;  %s792_s9 = int_to_ptr.vmem [resolvable:$true] %s97_s9 }
  0x36   : > { %s432_s16 = scalar_lea.hbm %s70_s14, 16  ;;  %p435_p12 = scmp.lt.u32.totalorder %s70_s14, %s927_s1 }
  0x37   : > { %p433_p11 = scmp.ne.s32.totalorder %s70_s14, %s432_s16  ;;  %p436_p13 = scmp.lt.u32.totalorder %s773_s0, %s432_s16 }
  0x38   : > { %p438_p1 = scmp.lt.u32.totalorder %s432_s16, %s70_s14 }
  0x39   : > { %p437_p0 = por %p436_p13, %p435_p12 }
  0x3b   : > { %p439_p2 = por %p438_p1, %p437_p0 }
  0x3d   : > { %p440_p3 = pnand %p439_p2, %p433_p11 }
  0x3f   : > { %443 = shalt.err (!%p440_p3)  }
  0x40   : > { %s444_s7 = scalar_lea.vmem %s765_s10, 16  ;;  %p449_p5 = scmp.lt.s32.totalorder %s765_s10, %s758_s5 }
  0x41   : > { %p445_p4 = scmp.ne.s32.totalorder %s765_s10, %s444_s7  ;;  %p450_p6 = scmp.lt.s32.totalorder %s782_s4, %s444_s7 }
  0x43   : > { %p451_p8 = por %p450_p6, %p449_p5 }
  0x45   : > { %p452_p10 = pnand %p451_p8, %p445_p4 }
  0x47   : > { %455 = shalt.err (!%p452_p10)  }
  0x48   : > { %83 = dma.hbm_to_vmem [thread:$0]  %s70_s14, 16, %s765_s10, [#allocation3 + $0x1] }
  0x49   : > { %s340_s15 = sshll.u32 %s763_s11, 4  ;;  %s101_s23 = sadd.s32 3, %s750_s29 }
  0x4a   : > { %s87_s6 = scalar_lea.hbm %s927_s1, %s340_s15  ;;  %s809_s8 = sld [smem:[#allocation5 + %s101_s23]] }
  0x4b   : > { %s456_s12 = scalar_lea.hbm %s87_s6, 16  ;;  %p459_p12 = scmp.lt.u32.totalorder %s87_s6, %s927_s1 }
  0x4c   : > { %p457_p11 = scmp.ne.s32.totalorder %s87_s6, %s456_s12  ;;  %p460_p13 = scmp.lt.u32.totalorder %s773_s0, %s456_s12 }
  0x4d   : > { %p462_p1 = scmp.lt.u32.totalorder %s456_s12, %s87_s6 }
  0x4e   : > { %p461_p0 = por %p460_p13, %p459_p12 }
  0x50   : > { %p463_p2 = por %p462_p1, %p461_p0 }
  0x52   : > { %p464_p3 = pnand %p463_p2, %p457_p11 }
  0x54   : > { %467 = shalt.err (!%p464_p3)  }
  0x55   : > { %s468_s10 = scalar_lea.vmem %s792_s9, 16  ;;  %p473_p5 = scmp.lt.s32.totalorder %s792_s9, %s758_s5 }
  0x56   : > { %p469_p4 = scmp.ne.s32.totalorder %s792_s9, %s468_s10  ;;  %p474_p6 = scmp.lt.s32.totalorder %s782_s4, %s468_s10 }
  0x58   : > { %p475_p8 = por %p474_p6, %p473_p5 }
  0x5a   : > { %p476_p10 = pnand %p475_p8, %p469_p4 }
  0x5c   : > { %479 = shalt.err (!%p476_p10)  }
  0x5d   : > { %100 = dma.hbm_to_vmem [thread:$0]  %s87_s6, 16, %s792_s9, [#allocation3 + $0x2] }
  0x5e   : > { %s118_s11 = sadd.s32 4, %s750_s29  ;;  %s678_s14 = smov [#allocation2 + $0x3]  }
  0x5f   : > { %s114_s17 = sshll.u32 %s678_s14, 4  ;;  %s119_s18 = sld [smem:[#allocation5 + %s118_s11]]  ;;  %s115_s17 = int_to_ptr.vmem [resolvable:$true] %s114_s17 }
  0x60   : > { %s679_s7 = smov [#allocation2 + $0x4]   ;;  %s135_s23 = sadd.s32 5, %s750_s29 }
  0x61   : > { %s131_s15 = sshll.u32 %s679_s7, 4  ;;  %s341_s24 = sshll.u32 %s809_s8, 4  ;;  %s824_s15 = int_to_ptr.vmem [resolvable:$true] %s131_s15 }
  0x62   : > { %s104_s13 = scalar_lea.hbm %s927_s1, %s341_s24  ;;  %s829_s16 = sld [smem:[#allocation5 + %s135_s23]] }
  0x63   : > { %s480_s10 = scalar_lea.hbm %s104_s13, 16  ;;  %p483_p12 = scmp.lt.u32.totalorder %s104_s13, %s927_s1 }
  0x64   : > { %p481_p11 = scmp.ne.s32.totalorder %s104_s13, %s480_s10  ;;  %p484_p13 = scmp.lt.u32.totalorder %s773_s0, %s480_s10 }
  0x65   : > { %p486_p1 = scmp.lt.u32.totalorder %s480_s10, %s104_s13 }
  0x66   : > { %p485_p0 = por %p484_p13, %p483_p12 }
  0x68   : > { %p487_p2 = por %p486_p1, %p485_p0 }
  0x6a   : > { %p488_p3 = pnand %p487_p2, %p481_p11 }
  0x6c   : > { %491 = shalt.err (!%p488_p3)  }
  0x6d   : > { %s492_s8 = scalar_lea.vmem %s115_s17, 16  ;;  %p497_p5 = scmp.lt.s32.totalorder %s115_s17, %s758_s5 }
  0x6e   : > { %p493_p4 = scmp.ne.s32.totalorder %s115_s17, %s492_s8  ;;  %p498_p6 = scmp.lt.s32.totalorder %s782_s4, %s492_s8 }
  0x70   : > { %p499_p8 = por %p498_p6, %p497_p5 }
  0x72   : > { %p500_p10 = pnand %p499_p8, %p493_p4 }
  0x74   : > { %503 = shalt.err (!%p500_p10)  }
  0x75   : > { %117 = dma.hbm_to_vmem [thread:$0]  %s104_s13, 16, %s115_s17, [#allocation3 + $0x3] }
  0x76   : > { %s342_s11 = sshll.u32 %s119_s18, 4  ;;  %s680_s24 = smov [#allocation2 + $0x5]  }
  0x77   : > { %s121_s23 = scalar_lea.hbm %s927_s1, %s342_s11  ;;  %s148_s3 = sshll.u32 %s680_s24, 4  ;;  %s149_s3 = int_to_ptr.vmem [resolvable:$true] %s148_s3 }
  0x78   : > { %s504_s12 = scalar_lea.hbm %s121_s23, 16  ;;  %p507_p12 = scmp.lt.u32.totalorder %s121_s23, %s927_s1 }
  0x79   : > { %p505_p11 = scmp.ne.s32.totalorder %s121_s23, %s504_s12  ;;  %p508_p13 = scmp.lt.u32.totalorder %s773_s0, %s504_s12 }
  0x7a   : > { %p510_p1 = scmp.lt.u32.totalorder %s504_s12, %s121_s23 }
  0x7b   : > { %p509_p0 = por %p508_p13, %p507_p12 }
  0x7d   : > { %p511_p2 = por %p510_p1, %p509_p0 }
  0x7f   : > { %p512_p3 = pnand %p511_p2, %p505_p11 }
  0x81   : > { %515 = shalt.err (!%p512_p3)  }
  0x82   : > { %s516_s17 = scalar_lea.vmem %s824_s15, 16  ;;  %p521_p5 = scmp.lt.s32.totalorder %s824_s15, %s758_s5 }
  0x83   : > { %p517_p4 = scmp.ne.s32.totalorder %s824_s15, %s516_s17  ;;  %p522_p6 = scmp.lt.s32.totalorder %s782_s4, %s516_s17 }
  0x85   : > { %p523_p8 = por %p522_p6, %p521_p5 }
  0x87   : > { %p524_p10 = pnand %p523_p8, %p517_p4 }
  0x89   : > { %527 = shalt.err (!%p524_p10)  }
  0x8a   : > { %134 = dma.hbm_to_vmem [thread:$0]  %s121_s23, 16, %s824_s15, [#allocation3 + $0x4] }
  0x8b   : > { %s152_s18 = sadd.s32 6, %s750_s29  ;;  %s343_s13 = sshll.u32 %s829_s16, 4 }
  0x8c   : > { %s153_s6 = sld [smem:[#allocation5 + %s152_s18]]  ;;  %s138_s14 = scalar_lea.hbm %s927_s1, %s343_s13 }
  0x8d   : > { %s528_s7 = scalar_lea.hbm %s138_s14, 16  ;;  %p531_p12 = scmp.lt.u32.totalorder %s138_s14, %s927_s1 }
  0x8e   : > { %p529_p11 = scmp.ne.s32.totalorder %s138_s14, %s528_s7  ;;  %p532_p13 = scmp.lt.u32.totalorder %s773_s0, %s528_s7 }
  0x8f   : > { %p534_p1 = scmp.lt.u32.totalorder %s528_s7, %s138_s14 }
  0x90   : > { %p533_p0 = por %p532_p13, %p531_p12 }
  0x92   : > { %p535_p2 = por %p534_p1, %p533_p0 }
  0x94   : > { %p536_p3 = pnand %p535_p2, %p529_p11 }
  0x96   : > { %539 = shalt.err (!%p536_p3)  }
  0x97   : > { %s540_s15 = scalar_lea.vmem %s149_s3, 16  ;;  %p545_p5 = scmp.lt.s32.totalorder %s149_s3, %s758_s5 }
  0x98   : > { %p541_p4 = scmp.ne.s32.totalorder %s149_s3, %s540_s15  ;;  %p546_p6 = scmp.lt.s32.totalorder %s782_s4, %s540_s15 }
  0x9a   : > { %p547_p8 = por %p546_p6, %p545_p5 }
  0x9c   : > { %p548_p10 = pnand %p547_p8, %p541_p4 }
  0x9e   : > { %551 = shalt.err (!%p548_p10)  }
  0x9f   : > { %151 = dma.hbm_to_vmem [thread:$0]  %s138_s14, 16, %s149_s3, [#allocation3 + $0x5] }
  0xa0   : > { %s681_s16 = smov [#allocation2 + $0x6]   ;;  %s169_s10 = sadd.s32 7, %s750_s29 }
  0xa1   : > { %s165_s23 = sshll.u32 %s681_s16, 4  ;;  %s170_s9 = sld [smem:[#allocation5 + %s169_s10]]  ;;  %s166_s23 = int_to_ptr.vmem [resolvable:$true] %s165_s23 }
  0xa2   : > { %s344_s17 = sshll.u32 %s153_s6, 4  ;;  %s682_s18 = smov [#allocation2 + $0x7]  }
  0xa3   : > { %s182_s13 = sshll.u32 %s682_s18, 4  ;;  %s155_s7 = scalar_lea.hbm %s927_s1, %s344_s17  ;;  %s183_s13 = int_to_ptr.vmem [resolvable:$true] %s182_s13 }
  0xa4   : > { %s552_s24 = scalar_lea.hbm %s155_s7, 16  ;;  %p555_p12 = scmp.lt.u32.totalorder %s155_s7, %s927_s1 }
  0xa5   : > { %p553_p11 = scmp.ne.s32.totalorder %s155_s7, %s552_s24  ;;  %p556_p13 = scmp.lt.u32.totalorder %s773_s0, %s552_s24 }
  0xa6   : > { %p558_p1 = scmp.lt.u32.totalorder %s552_s24, %s155_s7 }
  0xa7   : > { %p557_p0 = por %p556_p13, %p555_p12 }
  0xa9   : > { %p559_p2 = por %p558_p1, %p557_p0 }
  0xab   : > { %p560_p3 = pnand %p559_p2, %p553_p11 }
  0xad   : > { %563 = shalt.err (!%p560_p3)  }
  0xae   : > { %s564_s29 = scalar_lea.vmem %s166_s23, 16  ;;  %p569_p5 = scmp.lt.s32.totalorder %s166_s23, %s758_s5 }
  0xaf   : > { %p565_p4 = scmp.ne.s32.totalorder %s166_s23, %s564_s29  ;;  %p570_p6 = scmp.lt.s32.totalorder %s782_s4, %s564_s29 }
  0xb1   : > { %p571_p8 = por %p570_p6, %p569_p5 }
  0xb3   : > { %p572_p10 = pnand %p571_p8, %p565_p4 }
  0xb5   : > { %575 = shalt.err (!%p572_p10)  }
  0xb6   : > { %168 = dma.hbm_to_vmem [thread:$0]  %s155_s7, 16, %s166_s23, [#allocation3 + $0x6] }
  0xb7   : > { %s345_s3 = sshll.u32 %s170_s9, 4 }
  0xb8   : > { %s172_s16 = scalar_lea.hbm %s927_s1, %s345_s3 }
  0xb9   : > { %s576_s10 = scalar_lea.hbm %s172_s16, 16  ;;  %p579_p12 = scmp.lt.u32.totalorder %s172_s16, %s927_s1 }
  0xba   : > { %p577_p11 = scmp.ne.s32.totalorder %s172_s16, %s576_s10  ;;  %p580_p13 = scmp.lt.u32.totalorder %s773_s0, %s576_s10 }
  0xbb   : > { %p582_p1 = scmp.lt.u32.totalorder %s576_s10, %s172_s16 }
  0xbc   : > { %p581_p0 = por %p580_p13, %p579_p12 }
  0xbe   : > { %p583_p2 = por %p582_p1, %p581_p0 }
  0xc0   : > { %p584_p3 = pnand %p583_p2, %p577_p11 }
  0xc2   : > { %587 = shalt.err (!%p584_p3)  }
  0xc3   : > { %s588_s23 = scalar_lea.vmem %s183_s13, 16  ;;  %p593_p5 = scmp.lt.s32.totalorder %s183_s13, %s758_s5 }
  0xc4   : > { %p589_p4 = scmp.ne.s32.totalorder %s183_s13, %s588_s23  ;;  %p594_p6 = scmp.lt.s32.totalorder %s782_s4, %s588_s23 }
  0xc6   : > { %p595_p8 = por %p594_p6, %p593_p5 }
  0xc8   : > { %p596_p10 = pnand %p595_p8, %p589_p4 }
  0xca   : > { %599 = shalt.err (!%p596_p10)  }
  0xcb   : > { %185 = dma.hbm_to_vmem [thread:$0]  %s172_s16, 16, %s183_s13, [#allocation3 + $0x7] }
  0xcc   : > { %s51_s9 = scalar_lea.vmem [#allocation6], %s754_s30 }
  0xcd   : > { %642 = dma.done.wait [#allocation3], 16 }
  0xce   : > { %643 = vsyncadd [#allocation3], 4294967280 }
  0xcf   : > { %644 = dma.done.wait [#allocation3 + $0x1], 16 }
  0xd0   : > { %645 = vsyncadd [#allocation3 + $0x1], 4294967280 }
  0xd1   : > { %646 = dma.done.wait [#allocation3 + $0x2], 16 }
  0xd2   : > { %647 = vsyncadd [#allocation3 + $0x2], 4294967280 }
  0xd3   : > { %648 = dma.done.wait [#allocation3 + $0x3], 16 }
  0xd4   : > { %649 = vsyncadd [#allocation3 + $0x3], 4294967280 }
  0xd5   : > { %650 = dma.done.wait [#allocation3 + $0x4], 16 }
  0xd6   : > { %651 = vsyncadd [#allocation3 + $0x4], 4294967280 }
  0xd7   : > { %652 = dma.done.wait [#allocation3 + $0x5], 16 }
  0xd8   : > { %653 = vsyncadd [#allocation3 + $0x5], 4294967280 }
  0xd9   : > { %654 = dma.done.wait [#allocation3 + $0x6], 16 }
  0xda   : > { %655 = vsyncadd [#allocation3 + $0x6], 4294967280 }
  0xdb   : > { %656 = dma.done.wait [#allocation3 + $0x7], 16 }
  0xdc   : > { %657 = vsyncadd [#allocation3 + $0x7], 4294967280  ;;  %s347_s30 = sshll.u32 %s672_s21, 7  ;;  %s219_s5 = sshll.u32 %s51_s9, 4  ;;  %v203_v0 = vld [vmem:[#allocation2] sm:$0xff]  ;;  %s887_s5 = int_to_ptr.vmem [resolvable:$true] %s219_s5 }
  0xdd   : > { %s885_s13 = scalar_lea.hbm %s928_s2, %s347_s30  ;;  %204 = vst [vmem:[%s51_s9] sm:$0xff] %v203_v0  ;;  %s206_s8 = scalar_lea.sflag [#allocation7], %s49_s28 }
  0xde   : > { %s600_s11 = scalar_lea.vmem %s887_s5, 128  ;;  %s683_s7 = smov [#allocation6]  }
  0xdf   : > { %p601_p11 = scmp.ne.s32.totalorder %s887_s5, %s600_s11  ;;  %s604_s24 = sshll.u32 %s683_s7, 4  ;;  %s605_s24 = int_to_ptr.vmem [resolvable:$false] %s604_s24 }
  0xe0   : > { %s606_s12 = scalar_lea.vmem %s605_s24, 256  ;;  %p607_p0 = scmp.lt.s32.totalorder %s887_s5, %s605_s24 }
  0xe1   : > { %p602_p12 = pnand %p601_p11, %p739_p7  ;;  %p608_p1 = scmp.lt.s32.totalorder %s606_s12, %s600_s11 }
  0xe3   : > { %p603_p13 = pneg %p602_p12  ;;  %p609_p2 = por %p608_p1, %p607_p0 }
  0xe5   : > { %p610_p3 = pnand %p609_p2, %p603_p13 }
  0xe7   : > { %613 = shalt.err (!%p610_p3)
}
  0xe8   : > { %s614_s28 = scalar_lea.hbm %s885_s13, 128  ;;  %s618_s3 = scalar_lea.hbm %s928_s2, 512 }
  0xe9   : > { %p615_p4 = scmp.ne.s32.totalorder %s885_s13, %s614_s28  ;;  %p619_p8 = scmp.lt.u32.totalorder %s885_s13, %s928_s2 }
  0xea   : > { %p620_p10 = scmp.lt.u32.totalorder %s618_s3, %s614_s28  ;;  %p622_p12 = scmp.lt.u32.totalorder %s614_s28, %s885_s13 }
  0xeb   : > { %p616_p5 = pnand %p615_p4, %p739_p7 }
  0xec   : > { %p621_p11 = por %p620_p10, %p619_p8 }
  0xed   : > { %p617_p6 = pneg %p616_p5 }
  0xee   : > { %p623_p13 = por %p622_p12, %p621_p11 }
  0xf0   : > { %p624_p0 = pnand %p623_p13, %p617_p6 }
  0xf2   : > { %627 = shalt.err (!%p624_p0)
}
  0xf3   : > { %358 = dma.vmem_to_hbm [thread:$0]  (%p739_p7), %s887_s5, 128, %s885_s13, %s206_s8  }
  0xf4 PF: > { %p364_p1 = scmp.ge.s32.totalorder %s672_s21, 1  ;;  %s231_s16 = sand.u32 1, %s664_s19  }
  0xf5   : > { %s232_s10 = scalar_lea.sflag [#allocation7], %s231_s16 }
  0xf6   : > { %p361_p2 = pnand %p364_p1, %p743_p9 }
  0xf8   : > { %659 = dma.done.wait (!%p361_p2), %s232_s10, 128  }
  0xf9   : > { %661 = vsyncadd (!%p361_p2), %s232_s10, 4294967168  ;;  %p16_p3 = scmp.ge.s32.totalorder %s728_s22, 5   ;;  %s931_s19 = smov %s668_s20 }
  0xfa   : > { %s932_s20 = smov %s737_s25  ;;  %s933_s21 = smov %s728_s22 }
  0xfb   :  { %18 = sbr.rel (!%p16_p3) target bundleno = 15 (0xf), region = 105 }
 0x102   :  { %237 = vsyncpa [#allocation7], 1 }
 0x103   :  { %239 = vsyncpa [#allocation7 + $0x1], 1 }
 0x104   :  { %240 = vsyncmov [#allocation3] }
 0x107   :  { %s241_s21 = vpop.sfrf %240 }
 0x108   :  { %p350_p7 = scmp.ne.s32.totalorder %s241_s21, 0 }
 0x10a   :  { %245 = shalt.err (%p350_p7)  }
 0x10b   :  { %247 = vsyncmov [#allocation3 + $0x1] }
 0x10e   :  { %s248_s26 = vpop.sfrf %247 }
 0x10f   :  { %p351_p9 = scmp.ne.s32.totalorder %s248_s26, 0 }
 0x111   :  { %252 = shalt.err (%p351_p9)  }
 0x112   :  { %254 = vsyncmov [#allocation3 + $0x2] }
 0x115   :  { %s255_s27 = vpop.sfrf %254 }
 0x116   :  { %p352_p4 = scmp.ne.s32.totalorder %s255_s27, 0 }
 0x118   :  { %259 = shalt.err (%p352_p4)  }
 0x119   :  { %261 = vsyncmov [#allocation3 + $0x3] }
 0x11c   :  { %s262_s17 = vpop.sfrf %261 }
 0x11d   :  { %p353_p5 = scmp.ne.s32.totalorder %s262_s17, 0 }
 0x11f   :  { %266 = shalt.err (%p353_p5)  }
 0x120   :  { %268 = vsyncmov [#allocation3 + $0x4] }
 0x123   :  { %s269_s22 = vpop.sfrf %268 }
 0x124   :  { %p354_p6 = scmp.ne.s32.totalorder %s269_s22, 0 }
 0x126   :  { %273 = shalt.err (%p354_p6)  }
 0x127   :  { %275 = vsyncmov [#allocation3 + $0x5] }
 0x12a   :  { %s276_s1 = vpop.sfrf %275 }
 0x12b   :  { %p355_p8 = scmp.ne.s32.totalorder %s276_s1, 0 }
 0x12d   :  { %280 = shalt.err (%p355_p8)  }
 0x12e   :  { %282 = vsyncmov [#allocation3 + $0x6] }
 0x131   :  { %s283_s2 = vpop.sfrf %282 }
 0x132   :  { %p356_p10 = scmp.ne.s32.totalorder %s283_s2, 0 }
 0x134   :  { %287 = shalt.err (%p356_p10)  }
 0x135   :  { %289 = vsyncmov [#allocation3 + $0x7] }
 0x138   :  { %s290_s19 = vpop.sfrf %289 }
 0x139   :  { %p357_p11 = scmp.ne.s32.totalorder %s290_s19, 0 }
 0x13b   :  { %294 = shalt.err (%p357_p11)  }

</bundles_post_ra>
